<compile_context>
chip_gen: v6e
topology: v6e:2x2x1
jax: 0.10.0
libtpu: 0.0.40
codegen_flags: <defaults>
</compile_context>

<pallas_src>
import functools
import numpy as np
import jax
import jax.numpy as jnp
from jax.experimental import pallas as pl
from jax.experimental.pallas import tpu as pltpu


def _round_up(n: int, m: int) -> int:
    return -(-n // m) * m


def build_interp_matrix(n_knots: int, forecast_size: int, mode: str) -> np.ndarray:
    """Dense [n_knots, forecast_size] matrix reproducing F.interpolate 1-D."""
    j = np.arange(forecast_size)
    scale = n_knots / forecast_size
    W = np.zeros((n_knots, forecast_size), dtype=np.float32)
    if mode == "nearest":
        src = np.floor(j * scale).astype(np.int64)
        src = np.clip(src, 0, n_knots - 1)
        W[src, j] = 1.0
    elif mode == "linear":
        # align_corners=False source coordinate, clamped at 0 (PyTorch behavior).
        x = (j + 0.5) * scale - 0.5
        x = np.maximum(x, 0.0)
        x0 = np.minimum(np.floor(x).astype(np.int64), n_knots - 1)
        x1 = np.minimum(x0 + 1, n_knots - 1)
        lam = (x - x0).astype(np.float32)
        np.add.at(W, (x0, j), 1.0 - lam)
        np.add.at(W, (x1, j), lam)
    else:
        # TODO(synk): 'cubic' (bicubic) interpolation weights not implemented here.
        raise NotImplementedError(f"interpolation_mode={mode!r} not supported in this kernel")
    return W


def build_padded_interp_matrix(n_knots: int, forecast_size: int, out_features: int,
                               backcast_size: int, mode: str) -> np.ndarray:
    """[backcast_size + F*K, H*F] matrix fusing knot-slice + interpolation + permute.

    (theta @ W_pad)[b, h*F + f] == forecast[b, f, h]; a row-major reshape to
    [B, H, F] equals PyTorch's forecast.permute(0, 2, 1).  The first
    backcast_size rows are zero so the kernel multiplies the FULL theta block
    (no lane-unaligned in-kernel slice of the knot columns).
    """
    W = build_interp_matrix(n_knots, forecast_size, mode)        # [K, H]
    K, H, F = n_knots, forecast_size, out_features
    W_pad = np.zeros((backcast_size + F * K, H * F), dtype=np.float32)
    for f in range(F):
        W_pad[backcast_size + f * K: backcast_size + (f + 1) * K, f::F] = W
    return W_pad


def _identity_basis_kernel(theta_ref, w_ref, backcast_ref, forecast_ref, *, backcast_size):
    blk = theta_ref[...]                                   # [TB, D] — single HBM read
    backcast_ref[...] = blk[:, :backcast_size]             # prefix slice (lane-aligned start)
    # Fused interpolation + permute as one MXU matmul, lane-dense [TB, H*F], f32 acc.
    # NOTE: on the ragged last tile the padded rows carry garbage through the
    # matmul; the masked writeback discards them (harmless on TPU — no FP traps).
    forecast_ref[...] = jnp.dot(
        blk.astype(jnp.float32), w_ref[...], preferred_element_type=jnp.float32
    ).astype(forecast_ref.dtype)


def identity_basis_forward(theta, *, backcast_size, forecast_size, out_features,
                           interpolation_mode="linear", use_pallas=None):
    B, D = theta.shape
    n_knots_total = D - backcast_size
    assert n_knots_total > 0 and n_knots_total % out_features == 0
    n_knots = n_knots_total // out_features
    F_, H = out_features, forecast_size
    HF = H * F_

    # Interpolation weights stay float32 (matches PyTorch's f32 F.interpolate).
    W_pad = jnp.asarray(
        build_padded_interp_matrix(n_knots, H, F_, backcast_size, interpolation_mode),
        dtype=jnp.float32,
    )

    itemsize = jnp.dtype(theta.dtype).itemsize
    sub = max(8, 32 // itemsize)            # sublane multiple: 8 f32 / 16 bf16 / 32 int8

    # Auto fallback for tiny problems (launch + per-step overhead dominates).
    total_io_bytes = B * (D + backcast_size + HF) * itemsize
    if use_pallas is None:
        use_pallas = (total_io_bytes >= (1 << 20)) and (B >= 2 * sub)
    if not use_pallas:
        backcast = theta[:, :backcast_size]
        fc = jnp.dot(theta.astype(jnp.float32), W_pad,
                     preferred_element_type=jnp.float32).astype(theta.dtype)
        return backcast, fc.reshape(B, H, F_)

    pad_lane = lambda n: _round_up(n, 128)

    # Per-row VMEM footprint of the pipelined (double-buffered) batch tiles.
    per_row_bytes = (pad_lane(D) + pad_lane(backcast_size) + pad_lane(HF)) * itemsize * 2
    # Constant-index W_pad: DMA'd from HBM only once, but the pipeline holds 2 buffers.
    w_bytes = _round_up(D, 8) * pad_lane(HF) * 4

    # Per-generation VMEM budget (~70% of physical: 128 MiB v5e/v6e, 64 MiB v7x).
    try:
        vmem_cap = int(pltpu.get_tpu_info().vmem_capacity_bytes)
    except Exception:
        vmem_cap = 64 * 1024 * 1024          # conservative default (v7x per-TensorCore)
    vmem_budget = int(0.70 * vmem_cap)
    margin = 4 * 1024 * 1024

    tile_budget = max(2 * 1024 * 1024, vmem_budget - 2 * w_bytes - margin)
    tb_cap = max(sub, min(4096, (tile_budget // per_row_bytes) // sub * sub))

    # Keep the grid at ~8 steps whenever B allows: DMA/compute overlap via the
    # BlockSpec pipeline and lets the "parallel" axis split across v7x's 2 TCs.
    if B <= sub:
        TB = B                               # block dim == full array dim is allowed
    else:
        TB = max(sub, min(tb_cap, _round_up(pl.cdiv(B, 8), sub)))
    nb = pl.cdiv(B, TB)

    needed = TB * per_row_bytes + 2 * w_bytes + margin
    vmem_limit = min(vmem_budget, max(needed, 16 * 1024 * 1024))
    vmem_limit = int(max(vmem_limit, needed))   # never under-provision actual usage

    cost = pl.CostEstimate(
        flops=2 * B * D * HF,
        transcendentals=0,
        bytes_accessed=B * (D + backcast_size + HF) * itemsize + D * HF * 4,
    )

    kernel = functools.partial(_identity_basis_kernel, backcast_size=backcast_size)

    backcast, forecast_flat = pl.pallas_call(
        kernel,
        out_shape=(
            jax.ShapeDtypeStruct((B, backcast_size), theta.dtype),
            jax.ShapeDtypeStruct((B, HF), theta.dtype),
        ),
        grid=(nb,),
        in_specs=[
            pl.BlockSpec((TB, D), lambda i: (i, 0)),     # theta tile (read once)
            pl.BlockSpec((D, HF), lambda i: (0, 0)),     # constant W_pad (fetched once)
        ],
        out_specs=(
            pl.BlockSpec((TB, backcast_size), lambda i: (i, 0)),
            pl.BlockSpec((TB, HF), lambda i: (i, 0)),    # lane-dense forecast
        ),
        compiler_params=pltpu.CompilerParams(
            dimension_semantics=("parallel",),           # shard tiles across v7x TCs
            vmem_limit_bytes=vmem_limit,
        ),
        cost_estimate=cost,
    )(theta, W_pad)

    # Free row-major reshape; already in the permute(0, 2, 1) layout.
    forecast = forecast_flat.reshape(B, H, F_)
    return backcast, forecast


if __name__ == "__main__":
    def reference(theta, backcast_size, forecast_size, out_features, mode):
        B, D = theta.shape
        K = (D - backcast_size) // out_features
        W = jnp.asarray(build_interp_matrix(K, forecast_size, mode))      # [K, H] f32
        backcast = theta[:, :backcast_size]
        knots = theta[:, backcast_size:].astype(jnp.float32).reshape(B * out_features, K)
        fc = (knots @ W).reshape(B, out_features, forecast_size).transpose(0, 2, 1)
        return backcast, fc.astype(theta.dtype)

    key = jax.random.PRNGKey(0)

    # --- tiny shape (forces the Pallas path; TB == B, single grid step) ---
    B, backcast_size, forecast_size, out_features, n_knots = 2, 16, 12, 3, 4
    D = backcast_size + out_features * n_knots            # 28
    theta = jax.random.normal(key, (B, D), dtype=jnp.float32)
    for mode in ("linear", "nearest"):
        bc, fc = identity_basis_forward(theta, backcast_size=backcast_size,
                                        forecast_size=forecast_size,
                                        out_features=out_features,
                                        interpolation_mode=mode, use_pallas=True)
        jax.block_until_ready((bc, fc))
        bc_ref, fc_ref = reference(theta, backcast_size, forecast_size, out_features, mode)
        assert bc.shape == (B, backcast_size)
        assert fc.shape == (B, forecast_size, out_features)
        assert jnp.allclose(bc, bc_ref)
        assert jnp.allclose(fc, fc_ref, atol=1e-5), f"forecast mismatch (tiny, {mode})"

    # --- larger shape: multi-tile grid, ragged last tile, bf16 sublane packing ---
    B, backcast_size, forecast_size, out_features, n_knots = 200, 96, 24, 4, 8
    D = backcast_size + out_features * n_knots             # 128
    key2 = jax.random.PRNGKey(0)
    for dtype, atol in ((jnp.float32, 1e-5), (jnp.bfloat16, 3e-2)):
        theta = jax.random.normal(key2, (B, D), dtype=jnp.float32).astype(dtype)
        bc, fc = identity_basis_forward(theta, backcast_size=backcast_size,
                                        forecast_size=forecast_size,
                                        out_features=out_features,
                                        interpolation_mode="linear", use_pallas=True)
        jax.block_until_ready((bc, fc))
        bc_ref, fc_ref = reference(theta, backcast_size, forecast_size, out_features, "linear")
        assert jnp.allclose(bc.astype(jnp.float32), bc_ref.astype(jnp.float32))
        assert jnp.allclose(fc.astype(jnp.float32), fc_ref.astype(jnp.float32), atol=atol), \
            f"forecast mismatch (large, {dtype})"

    print("KERNEL_OK")
</pallas_src>

<mosaic_0001>
module attributes {stable_mosaic.version = 11 : i64} {
  func.func @_identity_basis_kernel(%arg0: i32, %arg1: memref<2x28xf32, #tpu.memory_space<vmem>>, %arg2: memref<28x36xf32, #tpu.memory_space<vmem>>, %arg3: memref<2x16xf32, #tpu.memory_space<vmem>>, %arg4: memref<2x36xf32, #tpu.memory_space<vmem>>) attributes {dimension_semantics = [#tpu.dimension_semantics<parallel>], iteration_bounds = array<i64: 1>, scalar_prefetch = 0 : i64, scratch_operands = 0 : i64, tpu.core_type = #tpu.core_type<tc>, window_params = [{transform_indices = @transform_0, window_bounds = array<i64: 2, 28>}, {pipeline_mode = #tpu.pipeline_mode<synchronous>, transform_indices = @transform_1, window_bounds = array<i64: 28, 36>}, {transform_indices = @transform_2, window_bounds = array<i64: 2, 16>}, {transform_indices = @transform_3, window_bounds = array<i64: 2, 36>}]} {
    %c0 = arith.constant 0 : index
    %c0_0 = arith.constant 0 : index
    %0 = vector.load %arg1[%c0, %c0_0] : memref<2x28xf32, #tpu.memory_space<vmem>>, vector<2x28xf32>
    %1 = vector.extract_strided_slice %0 {offsets = [0, 0], sizes = [2, 16], strides = [1, 1]} : vector<2x28xf32> to vector<2x16xf32>
    %c0_1 = arith.constant 0 : index
    %c0_2 = arith.constant 0 : index
    %2 = vector.load %arg3[%c0_1, %c0_2] : memref<2x16xf32, #tpu.memory_space<vmem>>, vector<2x16xf32>
    tpu.vector_store %arg3[%c0_1, %c0_2], %1 {strides = array<i32>} : memref<2x16xf32, #tpu.memory_space<vmem>>, vector<2x16xf32>,
    %c0_3 = arith.constant 0 : index
    %c0_4 = arith.constant 0 : index
    %3 = vector.load %arg2[%c0_3, %c0_4] : memref<28x36xf32, #tpu.memory_space<vmem>>, vector<28x36xf32>
    %cst = arith.constant dense<0.000000e+00> : vector<2x36xf32>
    %4 = tpu.matmul %0, %3, %cst {dimension_numbers = #tpu.dot_dimension_numbers<[1], [0], [0], [1], [0, 0, 1, 1], [], []>} : vector<2x28xf32>, vector<28x36xf32>, vector<2x36xf32> -> vector<2x36xf32>
    %c0_5 = arith.constant 0 : index
    %c0_6 = arith.constant 0 : index
    %5 = vector.load %arg4[%c0_5, %c0_6] : memref<2x36xf32, #tpu.memory_space<vmem>>, vector<2x36xf32>
    tpu.vector_store %arg4[%c0_5, %c0_6], %4 {strides = array<i32>} : memref<2x36xf32, #tpu.memory_space<vmem>>, vector<2x36xf32>,
    return
  }
  func.func @transform_0(%arg0: i32) -> (i32, i32) {
    %c0_i32 = arith.constant 0 : i32
    %c0_i32_0 = arith.constant 0 : i32
    return %arg0, %c0_i32 : i32, i32
  }
  func.func @transform_1(%arg0: i32) -> (i32, i32) {
    %c0_i32 = arith.constant 0 : i32
    %c0_i32_0 = arith.constant 0 : i32
    %c0_i32_1 = arith.constant 0 : i32
    return %c0_i32, %c0_i32_0 : i32, i32
  }
  func.func @transform_2(%arg0: i32) -> (i32, i32) {
    %c0_i32 = arith.constant 0 : i32
    %c0_i32_0 = arith.constant 0 : i32
    return %arg0, %c0_i32 : i32, i32
  }
  func.func @transform_3(%arg0: i32) -> (i32, i32) {
    %c0_i32 = arith.constant 0 : i32
    %c0_i32_0 = arith.constant 0 : i32
    return %arg0, %c0_i32 : i32, i32
  }
}

</mosaic_0001>

<bundles_post_ra>
// kernel: tpu_custom_call.1
= control target key start
LH: loop header
LB: loop body
LE: loop exit
PB: predicated region body
PF: predicated region fallthrough
CT: control target
= control target key end

     0   :  { %9 = vsyncpa [#allocation3], 0  ;;  %s312_s0 = inlined_call_operand.hbm [shape: f32[2,28], index: 0, kind: input, shape index: {}]   ;;  %s313_s1 = inlined_call_operand.hbm [shape: f32[28,36], index: 1, kind: input, shape index: {}]   ;;  %s314_s2 = inlined_call_operand.hbm [shape: f32[2,16], index: 2, kind: output, shape index: {0}]   ;;  %s315_s3 = inlined_call_operand.hbm [shape: f32[2,36], index: 3, kind: output, shape index: {1}]  }
   0x1   :  { %10 = vsyncpa [#allocation6], 0 }
   0x2   :  { %11 = vsyncpa [#allocation4], 0 }
   0x3   :  { %12 = vsyncpa [#allocation9], 0  ;;  %s272_s12 = smov [#allocation2]   ;;  %s273_s14 = smov [#allocation5]  }
   0x4   :  { %s19_s13 = sshll.u32 %s272_s12, 4  ;;  %s28_s15 = sshll.u32 %s273_s14, 4  ;;  %s20_s13 = int_to_ptr.vmem [resolvable:$true] %s19_s13  ;;  %s29_s15 = int_to_ptr.vmem [resolvable:$true] %s28_s15 }
   0x5   :  { %s192_s16 = scalar_lea.vmem %s20_s13, 32  ;;  %p197_p1 = scmp.lt.s32.totalorder %s20_s13, %s20_s13 }
   0x6   :  { %p193_p0 = scmp.ne.s32.totalorder %s20_s13, %s192_s16  ;;  %p198_p2 = scmp.lt.s32.totalorder %s192_s16, %s192_s16 }
   0x8   :  { %p199_p3 = por %p198_p2, %p197_p1 }
   0xa   :  { %p200_p4 = pnand %p199_p3, %p193_p0 }
   0xc   :  { %203 = shalt.err (!%p200_p4)
}
   0xd   :  { %22 = dma.hbm_to_vmem [thread:$0]  %s312_s0, 32, %s20_s13, [#allocation3]  }
   0xe   :  { %s212_s19 = scalar_lea.vmem %s29_s15, 512  ;;  %p217_p6 = scmp.lt.s32.totalorder %s29_s15, %s29_s15 }
   0xf   :  { %p213_p5 = scmp.ne.s32.totalorder %s29_s15, %s212_s19  ;;  %p218_p7 = scmp.lt.s32.totalorder %s212_s19, %s212_s19 }
  0x11   :  { %p219_p8 = por %p218_p7, %p217_p6 }
  0x13   :  { %p220_p9 = pnand %p219_p8, %p213_p5 }
  0x15   :  { %223 = shalt.err (!%p220_p9)
}
  0x16   :  { %s274_s20 = smov 128   ;;  %s275_s21 = smov 8  }
  0x17   :  { %34 = dma.hbm_to_vmem [thread:$0]  %s313_s1, 512, %s29_s15, [#allocation6], %s274_s20, %s274_s20, %s275_s21  }
  0x18   :  { %264 = dma.done.wait [#allocation3], 32  }
  0x19   :  { %265 = vsyncadd [#allocation3], 4294967264 }
  0x1a   :  { %266 = dma.done.wait [#allocation6], 512  }
  0x1b   :  { %267 = vsyncadd [#allocation6], 4294966784  ;;  %v276_v0 = vmov 0.0   ;;  %vm277_vm0 = vmmov 0   ;;  %vm52_vm1 = vcmask 1043456   ;;  %v46_v2 = vld [vmem:[#allocation5 + $0x10] sm:$0xff] }
  0x1c   :  { %165 = vmatprep.subr.mxu0 %v276_v0  ;;  %173 = vmatprep.mubr.msk.f32.mxu0 %vm277_vm0, %v276_v0  ;;  %v47_v1 = vld [vmem:[#allocation5 + $0x18] sm:$0xf]  ;;  %v45_v3 = vld [vmem:[#allocation5 + $0x8] sm:$0xff]  ;;  %v44_v4 = vld [vmem:[#allocation5] sm:$0xff]  ;;  %vm48_vm2 = vcmask 228352   ;;  %vm42_vm3 = vcmask 123904  }
  0x1d   :  { %166 = vmatpush3.msk.msra.mxu0 %vm52_vm1, %v47_v1  ;;  %v41_v5 = vld [vmem:[#allocation2] sm:$0x3]  ;;  %s278_s0 = smov [#allocation7]  }
  0x1e   :  { %167 = vmatprep.subr.mxu0 %v276_v0  ;;  %s134_s1 = sshll.u32 %s278_s0, 4  ;;  %43 = vst.msk [vmem:[#allocation7] sm:$0x3] %vm42_vm3, %v41_v5  ;;  %s135_s1 = int_to_ptr.vmem [resolvable:$true] %s134_s1 }
  0x1f   :  { %168 = vmatpush3.msra.mxu0 %v46_v2  ;;  %s224_s24 = scalar_lea.vmem %s135_s1, 32  ;;  %p229_p11 = scmp.lt.s32.totalorder %s135_s1, %s135_s1 }
  0x20   :  { %169 = vmatprep.subr.mxu0 %v276_v0  ;;  %p225_p10 = scmp.ne.s32.totalorder %s135_s1, %s224_s24  ;;  %p230_p12 = scmp.lt.s32.totalorder %s224_s24, %s224_s24 }
  0x21   :  { %170 = vmatpush3.msra.mxu0 %v45_v3 }
  0x22   :  { %171 = vmatprep.subr.mxu0 %v276_v0  ;;  %p231_p13 = por %p230_p12, %p229_p11 }
  0x23   :  { %172 = vmatpush3.msra.mxu0 %v44_v4 }
  0x24   :  { %174 = vmatmul.mubr.msk.f32.vlgmr.msra.gmra.mxu0 %vm48_vm2, %v41_v5  ;;  %p232_p0 = pnand %p231_p13, %p225_p10 }
  0x26   :  { %235 = shalt.err (!%p232_p0)
}
  0x27   :  { %137 = dma.vmem_to_hbm [thread:$0]  %s135_s1, 32, %s314_s2, [#allocation4]   ;;  %vm126_vm4 = vcmask 287744  }
  0x28   :  { %s279_s27 = smov [#allocation8]  }
  0x29   :  { %s144_s28 = sshll.u32 %s279_s27, 4  ;;  %s145_s28 = int_to_ptr.vmem [resolvable:$true] %s144_s28 }
  0x2a   :  { %s244_s29 = scalar_lea.vmem %s145_s28, 32  ;;  %p249_p2 = scmp.lt.s32.totalorder %s145_s28, %s145_s28 }
  0x2b   :  { %p245_p1 = scmp.ne.s32.totalorder %s145_s28, %s244_s29  ;;  %p250_p3 = scmp.lt.s32.totalorder %s244_s29, %s244_s29 }
  0x2d   :  { %p251_p4 = por %p250_p3, %p249_p2 }
  0x2f   :  { %p252_p5 = pnand %p251_p4, %p245_p1 }
  0xe4   :  { %v122_v6 = vpop.f32.mrf.mxu0 }
  0xe5   :  { %127 = vst.msk [vmem:[#allocation8] sm:$0x3] %vm126_vm4, %v122_v6 }
  0xe6   :  { %v175_v7 = vpop.f32.mrf.mxu0 }
  0xe7   :  { %255 = shalt.err (!%p252_p5)
}
  0xe8   :  { %147 = dma.vmem_to_hbm [thread:$0]  %s145_s28, 32, %s315_s3, [#allocation9]  }
  0xe9   :  { %268 = dma.done.wait [#allocation4], 32  }
  0xea   :  { %269 = vsyncadd [#allocation4], 4294967264 }
  0xeb   :  { %270 = dma.done.wait [#allocation9], 32  }
  0xec   :  { %271 = vsyncadd [#allocation9], 4294967264 }
  0xed   :  { %154 = vsyncpa [#allocation3], 1 }
  0xee   :  { %155 = vsyncpa [#allocation6], 1 }
  0xef   :  { %156 = vsyncpa [#allocation4], 1 }
  0xf0   :  { %157 = vsyncpa [#allocation9], 1 }

</bundles_post_ra>
